<compile_context>
chip_gen: v7x
topology: tpu7x:2x2x1
jax: 0.10.0
libtpu: 0.0.40
codegen_flags: <defaults>
</compile_context>

<pallas_src>
import jax
import jax.numpy as jnp
from jax.experimental import pallas as pl
from jax.experimental.pallas import tpu as pltpu


def _identity_kernel(x_ref, o_ref):
    # Pure pass-through of the current VMEM tile (VPU copy).
    o_ref[...] = x_ref[...]


def _sublane_multiple(dtype) -> int:
    """Minimum row multiple so the (sublane, 128) tile is legal for `dtype`."""
    itemsize = jnp.dtype(dtype).itemsize
    if itemsize >= 4:
        return 8
    if itemsize == 2:
        return 16
    return 32  # int8 / fp8


def _lane_dense_view(x: jax.Array):
    """Flatten to a lane-dense 2-D view (rows, lanes) with lanes % 128 == 0."""
    total = x.size
    min_rows = _sublane_multiple(x.dtype)
    # Prefer the widest lane dim whose row count is sublane-tile aligned.
    for lanes in (4096, 2048, 1024, 512, 256, 128):
        if total % lanes == 0 and (total // lanes) % min_rows == 0:
            return x.reshape(total // lanes, lanes)
    # Lane-dense but rows not sublane-aligned (tiny inputs): still fine, the
    # row block will use the full-extent exception or a masked edge.
    for lanes in (4096, 2048, 1024, 512, 256, 128):
        if total % lanes == 0:
            return x.reshape(total // lanes, lanes)
    # TODO(synk): totals not divisible by 128 would need padding to stay
    # lane-dense; the validation inputs here are always 128-multiples.
    return x.reshape(1, total)


def _pick_row_block(m: int, n: int, dtype) -> int:
    """Row block targeting ~2 MiB per VMEM buffer, sublane-tile aligned."""
    min_rows = _sublane_multiple(dtype)
    if m <= min_rows:
        return m  # full-extent row block (legal via the full-dim exception)
    itemsize = jnp.dtype(dtype).itemsize
    target_bytes = 2 * 1024 * 1024  # ~2 MiB/buffer: v7x-safe, amortizes DMA
    bm = min(m, max(min_rows, target_bytes // max(n * itemsize, 1)))
    bm -= bm % min_rows
    bm = max(bm, min_rows)
    # Prefer an exact divisor of m so every grid step stores a full tile.
    for cand in range(bm, min_rows - 1, -min_rows):
        if m % cand == 0:
            return cand
    return bm  # ragged last block; Pallas masks the out-of-bounds portion


def _pallas_identity(x: jax.Array) -> jax.Array:
    """Degenerate NlpNet 'body' as a Pallas TPU kernel: a tiled identity copy.

    Validation-only. forward() never calls this on the hot path because the
    reference module performs no computation.
    """
    orig_shape = x.shape
    x2d = _lane_dense_view(x)
    m, n = x2d.shape
    bm = _pick_row_block(m, n, x2d.dtype)
    grid = (pl.cdiv(m, bm),)

    out2d = pl.pallas_call(
        _identity_kernel,
        out_shape=jax.ShapeDtypeStruct((m, n), x2d.dtype),
        grid=grid,
        in_specs=[pl.BlockSpec((bm, n), lambda i: (i, 0))],
        out_specs=pl.BlockSpec((bm, n), lambda i: (i, 0)),
        compiler_params=pltpu.CompilerParams(
            dimension_semantics=("parallel",),  # v7x: both TCs split the rows
        ),
    )(x2d)

    return out2d.reshape(orig_shape)


class NlpNetPallas:
    """JAX/Pallas mirror of the PyTorch NlpNet module."""

    def __init__(self, validate_kernel: bool = False):
        # Reference __init__ defines no parameters / submodules.
        # `validate_kernel=True` optionally exercises (and blocks on) the
        # Pallas identity kernel inside forward() for debugging; default False
        # keeps the hot path at exactly zero work, matching the reference.
        self._validate_kernel = validate_kernel

    def forward(self, *inputs):
        # Reference forward is `pass` -> returns None. No kernel launch, no
        # host sync on the hot path.
        if self._validate_kernel and inputs:
            jax.block_until_ready(_pallas_identity(inputs[0]))
        return None

    def __call__(self, *inputs):
        return self.forward(*inputs)


if __name__ == "__main__":
    key = jax.random.PRNGKey(0)
    # Small NCHW input a caller might feed to forward().
    x = jax.random.normal(key, (2, 4, 16, 16), dtype=jnp.float32)

    # Validate the Pallas TPU path once, outside the module's hot path.
    y = _pallas_identity(x)
    jax.block_until_ready(y)
    assert y.shape == x.shape and y.dtype == x.dtype
    assert bool(jnp.all(y == x))

    # Match the reference module semantics: forward(...) returns None and
    # performs no computation.
    model = NlpNetPallas()
    out = model(x)
    assert out is None

    print("KERNEL_OK")
</pallas_src>

<mosaic_0001>
module attributes {stable_mosaic.version = 11 : i64} {
  func.func @_identity_kernel(%arg0: i32, %arg1: memref<8x256xf32, #tpu.memory_space<vmem>>, %arg2: memref<8x256xf32, #tpu.memory_space<vmem>>) attributes {dimension_semantics = [#tpu.dimension_semantics<parallel>], iteration_bounds = array<i64: 1>, scalar_prefetch = 0 : i64, scratch_operands = 0 : i64, tpu.core_type = #tpu.core_type<tc>, window_params = [{transform_indices = @transform_0, window_bounds = array<i64: 8, 256>}, {transform_indices = @transform_1, window_bounds = array<i64: 8, 256>}]} {
    %c0 = arith.constant 0 : index
    %c0_0 = arith.constant 0 : index
    %0 = vector.load %arg1[%c0, %c0_0] : memref<8x256xf32, #tpu.memory_space<vmem>>, vector<8x256xf32>
    %c0_1 = arith.constant 0 : index
    %c0_2 = arith.constant 0 : index
    %1 = vector.load %arg2[%c0_1, %c0_2] : memref<8x256xf32, #tpu.memory_space<vmem>>, vector<8x256xf32>
    tpu.vector_store %arg2[%c0_1, %c0_2], %0 {strides = array<i32>} : memref<8x256xf32, #tpu.memory_space<vmem>>, vector<8x256xf32>,
    return
  }
  func.func @transform_0(%arg0: i32) -> (i32, i32) {
    %c0_i32 = arith.constant 0 : i32
    %c0_i32_0 = arith.constant 0 : i32
    return %arg0, %c0_i32 : i32, i32
  }
  func.func @transform_1(%arg0: i32) -> (i32, i32) {
    %c0_i32 = arith.constant 0 : i32
    %c0_i32_0 = arith.constant 0 : i32
    return %arg0, %c0_i32 : i32, i32
  }
}

</mosaic_0001>

<bundles_post_ra>
// kernel: tpu_custom_call.1
= control target key start
LH: loop header
LB: loop body
LE: loop exit
PB: predicated region body
PF: predicated region fallthrough
CT: control target
= control target key end

     0   :  { %6 = vsyncpa [#allocation3], 0  ;;  %s126_s0 = inlined_call_operand.hbm [shape: f32[8,256], index: 0, kind: input, shape index: {}]   ;;  %s127_s1 = inlined_call_operand.hbm [shape: f32[8,256], index: 1, kind: output, shape index: {}]  }
   0x1   :  { %7 = vsyncpa [#allocation4], 0  ;;  %s90_s6 = smov [#allocation2]   ;;  %s42_s10 = scalar_lea.hbm %s126_s0, 256 }
   0x2   :  { %s14_s7 = sshll.u32 %s90_s6, 4  ;;  %p43_p0 = scmp.ne.s32.totalorder %s126_s0, %s42_s10  ;;  %s15_s7 = int_to_ptr.vmem [resolvable:$true] %s14_s7 }
   0x3   :  { %p46_p1 = scmp.lt.u32.totalorder %s42_s10, %s126_s0 }
   0x5   :  { %p48_p2 = pnand %p46_p1, %p43_p0 }
   0x7   :  { %51 = shalt.err (!%p48_p2)
}
   0x8   :  { %s52_s15 = scalar_lea.vmem %s15_s7, 256  ;;  %p57_p4 = scmp.lt.s32.totalorder %s15_s7, %s15_s7 }
   0x9   :  { %p53_p3 = scmp.ne.s32.totalorder %s15_s7, %s52_s15  ;;  %p58_p5 = scmp.lt.s32.totalorder %s52_s15, %s52_s15 }
   0xb   :  { %p59_p6 = por %p58_p5, %p57_p4 }
   0xd   :  { %p60_p7 = pnand %p59_p6, %p53_p3 }
   0xf   :  { %63 = shalt.err (!%p60_p7)
}
  0x10   :  { %17 = dma.hbm_to_vmem [thread:$0]  %s126_s0, 256, %s15_s7, [#allocation3]  }
  0x11   :  { %86 = dma.done.wait [#allocation3], 256  }
  0x12   :  { %87 = vsyncadd [#allocation3], 4294967040  ;;  %s91_s18 = smov [#allocation5]   ;;  %v21_v0 = vld [vmem:[#allocation2] sm:$0xff]  ;;  %v22_v1 = vld [vmem:[#allocation2 + $0x8] sm:$0xff] }
  0x13   :  { %s31_s19 = sshll.u32 %s91_s18, 4  ;;  %23 = vst [vmem:[#allocation5] sm:$0xff] %v21_v0  ;;  %24 = vst [vmem:[#allocation5 + $0x8] sm:$0xff] %v22_v1  ;;  %s32_s19 = int_to_ptr.vmem [resolvable:$true] %s31_s19 }
  0x14   :  { %s64_s20 = scalar_lea.vmem %s32_s19, 256  ;;  %p69_p9 = scmp.lt.s32.totalorder %s32_s19, %s32_s19 }
  0x15   :  { %p65_p8 = scmp.ne.s32.totalorder %s32_s19, %s64_s20  ;;  %p70_p10 = scmp.lt.s32.totalorder %s64_s20, %s64_s20 }
  0x17   :  { %p71_p11 = por %p70_p10, %p69_p9 }
  0x19   :  { %p72_p12 = pnand %p71_p11, %p65_p8 }
  0x1b   :  { %75 = shalt.err (!%p72_p12)
}
  0x1c   :  { %s76_s0 = scalar_lea.hbm %s127_s1, 256 }
  0x1d   :  { %p77_p13 = scmp.ne.s32.totalorder %s127_s1, %s76_s0  ;;  %p80_p0 = scmp.lt.u32.totalorder %s76_s0, %s127_s1 }
  0x1f   :  { %p82_p1 = pnand %p80_p0, %p77_p13 }
  0x21   :  { %85 = shalt.err (!%p82_p1)
}
  0x22   :  { %34 = dma.vmem_to_hbm [thread:$0]  %s32_s19, 256, %s127_s1, [#allocation4]  }
  0x23   :  { %88 = dma.done.wait [#allocation4], 256  }
  0x24   :  { %89 = vsyncadd [#allocation4], 4294967040 }
  0x25   :  { %38 = vsyncpa [#allocation3], 1 }
  0x26   :  { %39 = vsyncpa [#allocation4], 1 }

</bundles_post_ra>
